<compile_context>
chip_gen: v7x
topology: tpu7x:2x2x1
jax: 0.10.0
libtpu: 0.0.40
codegen_flags: <defaults>
</compile_context>

<pallas_src>
import jax
import jax.numpy as jnp
from jax import lax
from jax.experimental import pallas as pl
from jax.experimental.pallas import tpu as pltpu


_MAX_TILE_N = 16384            # absolute row-tile cap (keeps per-step working set sane)
_TARGET_BLOCK_BYTES = 1 << 20  # aim for ~1 MiB of logits per grid step


def _round_up(x, m):
    return (x + m - 1) // m * m


def _device_kind():
    try:
        return jax.devices()[0].device_kind.lower()
    except Exception:
        return ""


def _default_num_partials():
    """TensorCores per chip: 2 on v4/v5p/v7x (megacore), 1 on v5e/v6e."""
    kind = _device_kind()
    if ("v5 lite" in kind) or ("v5e" in kind) or ("v6" in kind):
        return 1
    if ("v4" in kind) or ("v5p" in kind) or ("7" in kind):
        return 2
    return 1


def _default_use_mxu():
    """Offload class-axis sums to the MXU on v7x (XLU becomes the binding slot there)."""
    return "7" in _device_kind()


def _vmem_caps():
    """(vmem_limit_bytes for CompilerParams, budget used for tile sizing)."""
    try:
        cap = int(getattr(pltpu.get_tpu_info(), "vmem_capacity_bytes", 0) or 0)
    except Exception:
        cap = 0
    if cap <= 0:
        cap = 64 * 1024 * 1024       # conservative fallback: v7x-sized physical VMEM
    vmem_limit = cap - (16 << 20)    # headroom for compiler-internal scratch
    tile_budget = vmem_limit - (8 << 20)
    return vmem_limit, tile_budget


def _choose_tile_n(rows_per_partial, c, itemsize, tile_budget):
    """Row-tile size: ~1 MiB logits blocks, capped by the per-chip VMEM budget."""
    bytes_per_row = (
        2 * c * itemsize   # double-buffered native-dtype logits block
        + 5 * c * 4        # f32 full-block temporaries (upcast / exp / masked selects)
        + 2 * 128 * 4      # (tile_n,1) int32 target block, lane-padded to 128, x2 buffers
        + 4 * 512          # lane-sparse (tile_n,1) f32 columns (m, lse, ...)
    )
    fixed = 2 * 8 * max(c, 128) * 4 + (2 << 20)   # alpha block + accumulators + slack
    cap = max((tile_budget - fixed) // bytes_per_row, 16)
    cap = max(int(cap) // 16 * 16, 16)

    tile_n = _round_up(max(_TARGET_BLOCK_BYTES // max(c * itemsize, 1), 16), 16)
    tile_n = min(tile_n, cap, _MAX_TILE_N, _round_up(rows_per_partial, 16))
    return max(tile_n, 16)


def _make_focal_partial_kernel(use_mxu):
    def kernel(logits_ref, target_ref, alpha_ref, num_ref, den_ref, num_acc, den_acc):
        j = pl.program_id(1)  # reduction axis over row tiles within this partial

        @pl.when(j == 0)
        def _init():
            num_acc[...] = jnp.zeros_like(num_acc)
            den_acc[...] = jnp.zeros_like(den_acc)

        x = logits_ref[...]        # (TILE_N, C) native dtype (bf16 stays bf16)
        target = target_ref[...]   # (TILE_N, 1) int32
        alpha = alpha_ref[...]     # (1, C) f32

        tn, c = x.shape
        class_ids = lax.broadcasted_iota(jnp.int32, (tn, c), 1)
        onehot = class_ids == target   # pad rows (target == C) are all-False -> weight 0

        # row max / compare run on the native block (exact); upcast once for exp/LSE.
        m = jnp.max(x, axis=1, keepdims=True).astype(jnp.float32)    # (TILE_N, 1)
        xf = x.astype(jnp.float32)
        e = jnp.exp(xf - m)                                          # EUP
        masked_alpha = jnp.where(onehot, alpha, 0.0)                 # (TILE_N, C) f32

        if use_mxu:
            # Offload the class-axis sums to the (otherwise idle) MXU.
            ones_c = jnp.ones((c, 1), jnp.float32)
            s = jnp.dot(e, ones_c, preferred_element_type=jnp.float32)               # (TILE_N,1)
            lse = jnp.log(s) + m
            w_row = jnp.dot(masked_alpha, ones_c, preferred_element_type=jnp.float32)
            tx_row = jnp.dot(jnp.where(onehot, xf, 0.0), ones_c,
                             preferred_element_type=jnp.float32)
            num_tile = jnp.sum(w_row * (lse - tx_row), keepdims=True)   # (1, 1)
            den_tile = jnp.sum(w_row, keepdims=True)
        else:
            # XLU path: only m / lse survive as lane-sparse columns; the target "gather"
            # is folded into two full-block masked reductions (no w/nll columns).
            lse = jnp.log(jnp.sum(e, axis=1, keepdims=True)) + m
            num_tile = jnp.sum(masked_alpha * (lse - xf), keepdims=True)  # (1, 1)
            den_tile = jnp.sum(masked_alpha, keepdims=True)

        num_acc[...] += num_tile
        den_acc[...] += den_tile

        # store the accumulators once, at the end of this partial's row sweep
        @pl.when(j == pl.num_programs(1) - 1)
        def _store():
            num_ref[...] = num_acc[...].reshape(1, 1, 1)
            den_ref[...] = den_acc[...].reshape(1, 1, 1)

    return kernel


def focal_loss(logits, target, alpha, gamma=2.0, *, num_partials=None,
               use_mxu_reductions=None):
    """Focal loss matching PyTorch FocalLoss.forward (weighted-mean CE -> focal)."""
    n, c = logits.shape
    assert alpha.shape == (c,), "Length of weight tensor must match the number of classes"

    if num_partials is None:
        num_partials = _default_num_partials()
    if use_mxu_reductions is None:
        use_mxu_reductions = _default_use_mxu()

    target2d = target.astype(jnp.int32).reshape(n, 1)
    alpha2d = alpha.astype(jnp.float32).reshape(1, c)

    itemsize = jnp.dtype(logits.dtype).itemsize
    vmem_limit, tile_budget = _vmem_caps()
    rows_per_partial = -(-n // num_partials)
    tile_n = _choose_tile_n(rows_per_partial, c, itemsize, tile_budget)

    n_pad = _round_up(n, tile_n * num_partials)
    tiles_per_partial = n_pad // (tile_n * num_partials)
    if n_pad != n:
        pad = n_pad - n
        logits = jnp.pad(logits, ((0, pad), (0, 0)))
        # pad rows get an out-of-range class id -> zero weight -> contribute nothing
        target2d = jnp.pad(target2d, ((0, pad), (0, 0)), constant_values=c)

    grid = (num_partials, tiles_per_partial)

    num, den = pl.pallas_call(
        _make_focal_partial_kernel(use_mxu_reductions),
        out_shape=(
            jax.ShapeDtypeStruct((num_partials, 1, 1), jnp.float32),
            jax.ShapeDtypeStruct((num_partials, 1, 1), jnp.float32),
        ),
        grid=grid,
        in_specs=[
            # logits stay in their native dtype over the DMA (halves HBM bytes for bf16)
            pl.BlockSpec((tile_n, c), lambda p, j: (p * tiles_per_partial + j, 0)),
            pl.BlockSpec((tile_n, 1), lambda p, j: (p * tiles_per_partial + j, 0)),
            pl.BlockSpec((1, c), lambda p, j: (0, 0)),
        ],
        out_specs=(
            pl.BlockSpec((1, 1, 1), lambda p, j: (p, 0, 0)),
            pl.BlockSpec((1, 1, 1), lambda p, j: (p, 0, 0)),
        ),
        scratch_shapes=[
            pltpu.VMEM((1, 1), jnp.float32),
            pltpu.VMEM((1, 1), jnp.float32),
        ],
        compiler_params=pltpu.CompilerParams(
            # axis 0 shards across TensorCores on megacore chips; axis 1 is the reduction.
            # TODO(synk): evaluate pltpu.CORE_PARALLEL on v7x if "parallel" does not shard.
            dimension_semantics=("parallel", "arbitrary"),
            vmem_limit_bytes=int(vmem_limit),
        ),
        cost_estimate=pl.CostEstimate(
            flops=10 * n_pad * c,
            transcendentals=n_pad * (c + 1),
            bytes_accessed=n_pad * c * itemsize + n_pad * 4 + c * 4 + 2 * num_partials * 4,
        ),
    )(logits, target2d, alpha2d)

    # tiny scalar epilogue: combine per-core partials + focal transform.
    # NOTE: if every selected class weight is zero, den == 0 and this yields NaN,
    # matching F.cross_entropy's weighted-mean behavior for degenerate inputs.
    logp = jnp.sum(num) / jnp.sum(den)          # weighted-mean cross entropy (scalar)
    p = jnp.exp(-logp)
    q = 1.0 - p
    focal = (q * q if gamma == 2 else q ** gamma) * logp
    return focal


def focal_loss_ref(logits, target, alpha, gamma=2.0):
    logprobs = jax.nn.log_softmax(logits.astype(jnp.float32), axis=1)
    nll = -jnp.take_along_axis(logprobs, target[:, None].astype(jnp.int32), axis=1)[:, 0]
    w = alpha.astype(jnp.float32)[target]
    logp = jnp.sum(w * nll) / jnp.sum(w)
    p = jnp.exp(-logp)
    return (1.0 - p) ** gamma * logp


if __name__ == "__main__":
    key = jax.random.PRNGKey(0)
    k1, k2 = jax.random.split(key)

    # small shapes; odd N exercises padding and (on megacore chips) the 2-way partial split
    N, C = 37, 16
    logits = jax.random.normal(k1, (N, C), dtype=jnp.float32)
    target = jax.random.randint(k2, (N,), 0, C, dtype=jnp.int32)
    alpha = jnp.linspace(0.5, 1.5, C, dtype=jnp.float32)  # per-class weights

    ref = focal_loss_ref(logits, target, alpha)

    # 1) default-precision path (XLU class-axis reductions, f32 throughout)
    loss = focal_loss(logits, target, alpha, use_mxu_reductions=False)
    jax.block_until_ready(loss)
    assert jnp.allclose(loss, ref, atol=1e-5, rtol=1e-5), (loss, ref)

    # 2) MXU-offloaded class-axis reductions (v7x fast path); MXU f32 passes can be
    #    bf16-grade, so use a training-loss tolerance.
    loss_mxu = focal_loss(logits, target, alpha, use_mxu_reductions=True)
    jax.block_until_ready(loss_mxu)
    assert jnp.allclose(loss_mxu, ref, atol=2e-2, rtol=2e-2), (loss_mxu, ref)

    # 3) bf16 logits stay bf16 over the HBM->VMEM DMA (intended fast path)
    loss_bf16 = focal_loss(logits.astype(jnp.bfloat16), target, alpha,
                           use_mxu_reductions=False)
    jax.block_until_ready(loss_bf16)
    assert jnp.allclose(loss_bf16, ref, atol=2e-2, rtol=2e-2), (loss_bf16, ref)

    print("KERNEL_OK")
</pallas_src>

<mosaic_0001>
module attributes {stable_mosaic.version = 11 : i64} {
  func.func @kernel(%arg0: i32, %arg1: i32, %arg2: memref<48x16xf32, #tpu.memory_space<vmem>>, %arg3: memref<48x1xi32, #tpu.memory_space<vmem>>, %arg4: memref<1x16xf32, #tpu.memory_space<vmem>>, %arg5: memref<1x1x1xf32, #tpu.memory_space<vmem>>, %arg6: memref<1x1x1xf32, #tpu.memory_space<vmem>>, %arg7: memref<1x1xf32, #tpu.memory_space<vmem>>, %arg8: memref<1x1xf32, #tpu.memory_space<vmem>>) attributes {dimension_semantics = [#tpu.dimension_semantics<parallel>, #tpu.dimension_semantics<arbitrary>], iteration_bounds = array<i64: 1, 1>, scalar_prefetch = 0 : i64, scratch_operands = 2 : i64, tpu.core_type = #tpu.core_type<tc>, window_params = [{transform_indices = @transform_0, window_bounds = array<i64: 48, 16>}, {transform_indices = @transform_1, window_bounds = array<i64: 48, 1>}, {pipeline_mode = #tpu.pipeline_mode<synchronous>, transform_indices = @transform_2, window_bounds = array<i64: 1, 16>}, {transform_indices = @transform_3, window_bounds = array<i64: 1, 1, 1>}, {transform_indices = @transform_4, window_bounds = array<i64: 1, 1, 1>}]} {
    %c0_i32 = arith.constant 0 : i32
    %0 = arith.cmpi eq, %arg1, %c0_i32 : i32
    %1 = arith.extui %0 : i1 to i32
    %c0_i32_0 = arith.constant 0 : i32
    %2 = arith.cmpi ne, %1, %c0_i32_0 : i32
    scf.if %2 {
      %cst_20 = arith.constant 0.000000e+00 : f32
      %44 = vector.broadcast %cst_20 : f32 to vector<1x1xf32>
      %c0_21 = arith.constant 0 : index
      %c0_22 = arith.constant 0 : index
      %45 = vector.load %arg7[%c0_21, %c0_22] : memref<1x1xf32, #tpu.memory_space<vmem>>, vector<1x1xf32>
      tpu.vector_store %arg7[%c0_21, %c0_22], %44 {strides = array<i32>} : memref<1x1xf32, #tpu.memory_space<vmem>>, vector<1x1xf32>,
      %cst_23 = arith.constant 0.000000e+00 : f32
      %46 = vector.broadcast %cst_23 : f32 to vector<1x1xf32>
      %c0_24 = arith.constant 0 : index
      %c0_25 = arith.constant 0 : index
      %47 = vector.load %arg8[%c0_24, %c0_25] : memref<1x1xf32, #tpu.memory_space<vmem>>, vector<1x1xf32>
      tpu.vector_store %arg8[%c0_24, %c0_25], %46 {strides = array<i32>} : memref<1x1xf32, #tpu.memory_space<vmem>>, vector<1x1xf32>,
    } else {
    }
    %c0 = arith.constant 0 : index
    %c0_1 = arith.constant 0 : index
    %3 = vector.load %arg2[%c0, %c0_1] : memref<48x16xf32, #tpu.memory_space<vmem>>, vector<48x16xf32>
    %c0_2 = arith.constant 0 : index
    %c0_3 = arith.constant 0 : index
    %4 = vector.load %arg3[%c0_2, %c0_3] : memref<48x1xi32, #tpu.memory_space<vmem>>, vector<48x1xi32>
    %c0_4 = arith.constant 0 : index
    %c0_5 = arith.constant 0 : index
    %5 = vector.load %arg4[%c0_4, %c0_5] : memref<1x16xf32, #tpu.memory_space<vmem>>, vector<1x16xf32>
    %6 = tpu.iota {dimensions = array<i32: 1>} : vector<48x16xi32>
    %7 = vector.broadcast %4 : vector<48x1xi32> to vector<48x16xi32>
    %8 = arith.cmpi eq, %6, %7 : vector<48x16xi32>
    %cst = arith.constant dense<0xFF800000> : vector<48xf32>
    %9 = vector.multi_reduction <maximumf>, %3, %cst [1] : vector<48x16xf32> to vector<48xf32>
    %10 = vector.shape_cast %9 : vector<48xf32> to vector<48x1xf32>
    %11 = vector.broadcast %10 : vector<48x1xf32> to vector<48x16xf32>
    %12 = arith.subf %3, %11 : vector<48x16xf32>
    %13 = math.exp %12 : vector<48x16xf32>
    %cst_6 = arith.constant 0.000000e+00 : f32
    %14 = vector.shape_cast %5 : vector<1x16xf32> to vector<1x16xf32>
    %15 = vector.broadcast %14 : vector<1x16xf32> to vector<48x16xf32>
    %16 = vector.broadcast %cst_6 : f32 to vector<48x16xf32>
    %17 = arith.select %8, %15, %16 : vector<48x16xi1>, vector<48x16xf32>
    %cst_7 = arith.constant dense<0.000000e+00> : vector<48xf32>
    %18 = vector.multi_reduction <add>, %13, %cst_7 [1] : vector<48x16xf32> to vector<48xf32>
    %19 = vector.shape_cast %18 : vector<48xf32> to vector<48x1xf32>
    %20 = math.log %19 : vector<48x1xf32>
    %21 = arith.addf %20, %10 : vector<48x1xf32>
    %22 = vector.broadcast %21 : vector<48x1xf32> to vector<48x16xf32>
    %23 = arith.subf %22, %3 : vector<48x16xf32>
    %24 = arith.mulf %17, %23 : vector<48x16xf32>
    %25 = vector.shape_cast %24 : vector<48x16xf32> to vector<1x48x16xf32>
    %cst_8 = arith.constant dense<0.000000e+00> : vector<1xf32>
    %26 = vector.multi_reduction <add>, %25, %cst_8 [1, 2] : vector<1x48x16xf32> to vector<1xf32>
    %27 = vector.shape_cast %26 : vector<1xf32> to vector<1x1x1xf32>
    %28 = vector.extract %27[0, 0, 0] : f32 from vector<1x1x1xf32>
    %29 = vector.broadcast %28 : f32 to vector<1x1xf32>
    %30 = vector.shape_cast %17 : vector<48x16xf32> to vector<1x48x16xf32>
    %cst_9 = arith.constant dense<0.000000e+00> : vector<1xf32>
    %31 = vector.multi_reduction <add>, %30, %cst_9 [1, 2] : vector<1x48x16xf32> to vector<1xf32>
    %32 = vector.shape_cast %31 : vector<1xf32> to vector<1x1x1xf32>
    %33 = vector.extract %32[0, 0, 0] : f32 from vector<1x1x1xf32>
    %34 = vector.broadcast %33 : f32 to vector<1x1xf32>
    %c0_10 = arith.constant 0 : index
    %c0_11 = arith.constant 0 : index
    %35 = vector.load %arg7[%c0_10, %c0_11] : memref<1x1xf32, #tpu.memory_space<vmem>>, vector<1x1xf32>
    %36 = arith.addf %35, %29 : vector<1x1xf32>
    %c0_12 = arith.constant 0 : index
    %c0_13 = arith.constant 0 : index
    %37 = vector.load %arg7[%c0_12, %c0_13] : memref<1x1xf32, #tpu.memory_space<vmem>>, vector<1x1xf32>
    tpu.vector_store %arg7[%c0_12, %c0_13], %36 {strides = array<i32>} : memref<1x1xf32, #tpu.memory_space<vmem>>, vector<1x1xf32>,
    %c0_14 = arith.constant 0 : index
    %c0_15 = arith.constant 0 : index
    %38 = vector.load %arg8[%c0_14, %c0_15] : memref<1x1xf32, #tpu.memory_space<vmem>>, vector<1x1xf32>
    %39 = arith.addf %38, %34 : vector<1x1xf32>
    %c0_16 = arith.constant 0 : index
    %c0_17 = arith.constant 0 : index
    %40 = vector.load %arg8[%c0_16, %c0_17] : memref<1x1xf32, #tpu.memory_space<vmem>>, vector<1x1xf32>
    tpu.vector_store %arg8[%c0_16, %c0_17], %39 {strides = array<i32>} : memref<1x1xf32, #tpu.memory_space<vmem>>, vector<1x1xf32>,
    %c0_i32_18 = arith.constant 0 : i32
    %41 = arith.cmpi eq, %arg1, %c0_i32_18 : i32
    %42 = arith.extui %41 : i1 to i32
    %c0_i32_19 = arith.constant 0 : i32
    %43 = arith.cmpi ne, %42, %c0_i32_19 : i32
    scf.if %43 {
      %c0_20 = arith.constant 0 : index
      %c0_21 = arith.constant 0 : index
      %44 = vector.load %arg7[%c0_20, %c0_21] : memref<1x1xf32, #tpu.memory_space<vmem>>, vector<1x1xf32>
      %45 = vector.shape_cast %44 : vector<1x1xf32> to vector<1x1x1xf32>
      %c0_22 = arith.constant 0 : index
      %c0_23 = arith.constant 0 : index
      %c0_24 = arith.constant 0 : index
      %46 = vector.load %arg5[%c0_22, %c0_23, %c0_24] : memref<1x1x1xf32, #tpu.memory_space<vmem>>, vector<1x1x1xf32>
      tpu.vector_store %arg5[%c0_22, %c0_23, %c0_24], %45 {strides = array<i32>} : memref<1x1x1xf32, #tpu.memory_space<vmem>>, vector<1x1x1xf32>,
      %c0_25 = arith.constant 0 : index
      %c0_26 = arith.constant 0 : index
      %47 = vector.load %arg8[%c0_25, %c0_26] : memref<1x1xf32, #tpu.memory_space<vmem>>, vector<1x1xf32>
      %48 = vector.shape_cast %47 : vector<1x1xf32> to vector<1x1x1xf32>
      %c0_27 = arith.constant 0 : index
      %c0_28 = arith.constant 0 : index
      %c0_29 = arith.constant 0 : index
      %49 = vector.load %arg6[%c0_27, %c0_28, %c0_29] : memref<1x1x1xf32, #tpu.memory_space<vmem>>, vector<1x1x1xf32>
      tpu.vector_store %arg6[%c0_27, %c0_28, %c0_29], %48 {strides = array<i32>} : memref<1x1x1xf32, #tpu.memory_space<vmem>>, vector<1x1x1xf32>,
    } else {
    }
    return
  }
  func.func @transform_0(%arg0: i32, %arg1: i32) -> (i32, i32) {
    %c1_i32 = arith.constant 1 : i32
    %0 = arith.muli %arg0, %c1_i32 : i32
    %1 = arith.addi %0, %arg1 : i32
    %c0_i32 = arith.constant 0 : i32
    %c0_i32_0 = arith.constant 0 : i32
    return %1, %c0_i32 : i32, i32
  }
  func.func @transform_1(%arg0: i32, %arg1: i32) -> (i32, i32) {
    %c1_i32 = arith.constant 1 : i32
    %0 = arith.muli %arg0, %c1_i32 : i32
    %1 = arith.addi %0, %arg1 : i32
    %c0_i32 = arith.constant 0 : i32
    %c0_i32_0 = arith.constant 0 : i32
    return %1, %c0_i32 : i32, i32
  }
  func.func @transform_2(%arg0: i32, %arg1: i32) -> (i32, i32) {
    %c0_i32 = arith.constant 0 : i32
    %c0_i32_0 = arith.constant 0 : i32
    %c0_i32_1 = arith.constant 0 : i32
    return %c0_i32, %c0_i32_0 : i32, i32
  }
  func.func @transform_3(%arg0: i32, %arg1: i32) -> (i32, i32, i32) {
    %c0_i32 = arith.constant 0 : i32
    %c0_i32_0 = arith.constant 0 : i32
    %c0_i32_1 = arith.constant 0 : i32
    return %arg0, %c0_i32, %c0_i32_0 : i32, i32, i32
  }
  func.func @transform_4(%arg0: i32, %arg1: i32) -> (i32, i32, i32) {
    %c0_i32 = arith.constant 0 : i32
    %c0_i32_0 = arith.constant 0 : i32
    %c0_i32_1 = arith.constant 0 : i32
    return %arg0, %c0_i32, %c0_i32_0 : i32, i32, i32
  }
}

</mosaic_0001>

<bundles_post_ra>
// kernel: tpu_custom_call.1
= control target key start
LH: loop header
LB: loop body
LE: loop exit
PB: predicated region body
PF: predicated region fallthrough
CT: control target
= control target key end

     0   :  { %10 = vsyncpa [#allocation5], 0  ;;  %vm108_vm0 = vcmask 130048   ;;  %s568_s0 = inlined_call_operand.vmem [shape: f32[48,16], index: 0, kind: input, shape index: {}]   ;;  %s569_s1 = inlined_call_operand.vmem [shape: s32[48,1], index: 1, kind: input, shape index: {}]   ;;  %s570_s2 = inlined_call_operand.vmem [shape: f32[1,16], index: 2, kind: input, shape index: {}]   ;;  %s571_s3 = inlined_call_operand.hbm [shape: f32[1,1,1], index: 3, kind: output, shape index: {0}]   ;;  %s572_s4 = inlined_call_operand.hbm [shape: f32[1,1,1], index: 4, kind: output, shape index: {1}]  }
   0x1   :  { %v416_v0 = vld [vmem:[%s568_s0] sm:$0xff]  ;;  %v421_v1 = vld [vmem:[%s568_s0 + $0x10] sm:$0xff]  ;;  %v426_v2 = vld [vmem:[%s568_s0 + $0x8] sm:$0xff] }
   0x2   :  { %v109_v3 = vsel %vm108_vm0, %v416_v0, -inf  ;;  %v115_v4 = vsel %vm108_vm0, %v421_v1, -inf  ;;  %v435_v5 = vld [vmem:[%s568_s0 + $0x18] sm:$0xff] }
   0x3   :  { %110 = vmax.xlane.f32.xlu0 %v109_v3  ;;  %116 = vmax.xlane.f32.xlu1 %v115_v4 }
   0x4   :  { %11 = vsyncpa [#allocation7], 0  ;;  %v112_v6 = vsel %vm108_vm0, %v426_v2, -inf  ;;  %v118_v7 = vsel %vm108_vm0, %v435_v5, -inf  ;;  %v444_v8 = vld [vmem:[%s568_s0 + $0x20] sm:$0xff]  ;;  %v449_v9 = vld [vmem:[%s568_s0 + $0x28] sm:$0xff]  ;;  %v82_v55 = vlaneseq }
   0x5   :  { %v121_v10 = vsel %vm108_vm0, %v444_v8, -inf  ;;  %v124_v11 = vsel %vm108_vm0, %v449_v9, -inf  ;;  %v384_v12 = vmov 0   ;;  %v76_v38 = vld [vmem:[%s569_s1 + $0x8] sm:$0xff]  ;;  %v77_v39 = vld [vmem:[%s569_s1 + $0x10] sm:$0xff]  ;;  %v75_v40 = vld [vmem:[%s569_s1] sm:$0xff] }
   0x6   :  { %311 = vset.pattern.permute.xlu1 %v384_v12  ;;  %310 = vset.pattern.permute.xlu0 %v384_v12  ;;  %v78_v41 = vld [vmem:[%s569_s1 + $0x18] sm:$0xff]  ;;  %v79_v42 = vld [vmem:[%s569_s1 + $0x20] sm:$0xff]  ;;  %v80_v48 = vld [vmem:[%s569_s1 + $0x28] sm:$0xff]  ;;  %v83_v59 = vand.u32 127, %v82_v55  ;;  %vm66_vm7 = vcmask 0   ;;  %s386_s14 = smov [#allocation4]  }
   0x7   :  { %113 = vmax.xlane.f32.xlu0 %v112_v6  ;;  %119 = vmax.xlane.f32.xlu1 %v118_v7  ;;  %v301_v63 = vld [vmem:[%s570_s2] ss:$0 sm:$0xff]  ;;  %s267_s15 = sshll.u32 %s386_s14, 4  ;;  %s387_s16 = smov [#allocation6]   ;;  %s268_s15 = int_to_ptr.vmem [resolvable:$true] %s267_s15 }
   0x8   :  { %s277_s17 = sshll.u32 %s387_s16, 4  ;;  %s336_s18 = scalar_lea.vmem %s268_s15, 16  ;;  %s534_s17 = int_to_ptr.vmem [resolvable:$true] %s277_s17 }
   0x9   :  { %p337_p0 = scmp.ne.s32.totalorder %s268_s15, %s336_s18  ;;  %s340_s19 = scalar_lea.vmem %s268_s15, 32 }
   0xa   :  { %p341_p1 = scmp.lt.s32.totalorder %s268_s15, %s268_s15  ;;  %p342_p2 = scmp.lt.s32.totalorder %s340_s19, %s336_s18 }
   0xb   :  { %122 = vmax.xlane.f32.xlu0 %v121_v10  ;;  %125 = vmax.xlane.f32.xlu1 %v124_v11 }
   0xc   :  { %p343_p3 = por %p342_p2, %p341_p1 }
   0xe   :  { %p344_p4 = pnand %p343_p3, %p337_p0 }
  0x90   :  { %v455_v13 = vpop.xlane.xlu0 %110  ;;  %v457_v14 = vpop.xlane.xlu1 %116 }
  0x91   :  { %v127_v15 = vsub.f32 %v416_v0, %v455_v13  ;;  %v129_v16 = vsub.f32 %v421_v1, %v457_v14 }
  0x93   :  { %v133_v17 = vmul.f32 1.442695, %v127_v15  ;;  %v137_v18 = vmul.f32 1.442695, %v129_v16 }
  0x94   :  { %v463_v19 = vpop.xlane.xlu0 %113  ;;  %v465_v20 = vpop.xlane.xlu1 %119 }
  0x95   :  { %312 = vpow2.f32 %v133_v17  ;;  %v128_v21 = vsub.f32 %v426_v2, %v463_v19  ;;  %v130_v22 = vsub.f32 %v435_v5, %v465_v20 }
  0x96   :  { %314 = vpow2.f32 %v137_v18 }
  0x97   :  { %v135_v23 = vmul.f32 1.442695, %v128_v21  ;;  %v139_v24 = vmul.f32 1.442695, %v130_v22 }
  0x98   :  { %v471_v25 = vpop.xlane.xlu0 %122  ;;  %v495_v43 = vpop.xlane.xlu1 %125 }
  0x99   :  { %316 = vpow2.f32 %v135_v23  ;;  %v131_v26 = vsub.f32 %v444_v8, %v471_v25  ;;  %v132_v44 = vsub.f32 %v449_v9, %v495_v43 }
  0x9a   :  { %318 = vpow2.f32 %v139_v24 }
  0x9b   :  { %v141_v27 = vmul.f32 1.442695, %v131_v26  ;;  %v143_v45 = vmul.f32 1.442695, %v132_v44 }
  0x9d   :  { %320 = vpow2.f32 %v141_v27 }
  0x9e   :  { %322 = vpow2.f32 %v143_v45 }
  0x9f   :  { %v313_v28 = vpop.eup %312 }
  0xa0   :  { %v315_v29 = vpop.eup %314  ;;  %v157_v30 = vsel %vm108_vm0, %v313_v28, 0.0 }
  0xa1   :  { %158 = vadd.xlane.f32.xlu0 %v157_v30  ;;  %v163_v31 = vsel %vm108_vm0, %v315_v29, 0.0 }
  0xa3   :  { %v317_v32 = vpop.eup %316 }
  0xa4   :  { %v319_v33 = vpop.eup %318  ;;  %v160_v34 = vsel %vm108_vm0, %v317_v32, 0.0 }
  0xa5   :  { %164 = vadd.xlane.f32.xlu0 %v163_v31  ;;  %161 = vadd.xlane.f32.xlu1 %v160_v34  ;;  %v166_v35 = vsel %vm108_vm0, %v319_v33, 0.0 }
  0xa7   :  { %v321_v36 = vpop.eup %320 }
  0xa8   :  { %v169_v37 = vsel %vm108_vm0, %v321_v36, 0.0  ;;  %v323_v46 = vpop.eup %322 }
  0xa9   :  { %167 = vadd.xlane.f32.xlu1 %v166_v35  ;;  %170 = vadd.xlane.f32.xlu0 %v169_v37  ;;  %v172_v47 = vsel %vm108_vm0, %v323_v46, 0.0 }
  0xba   :  { %88 = vperm.xlu1 %311, %v76_v38  }
  0xbe   :  { %91 = vperm.xlu1 %311, %v77_v39  }
  0xbf   :  { %85 = vperm.xlu0 %310, %v75_v40  }
  0xc2   :  { %94 = vperm.xlu1 %311, %v78_v41  }
  0xc6   :  { %97 = vperm.xlu1 %311, %v79_v42  }
  0xea   :  { %173 = vadd.xlane.f32.xlu1 %v172_v47 }
  0xfb   :  { %100 = vperm.xlu1 %311, %v80_v48  }
 0x12e   :  { %v159_v50 = vpop.xlane.xlu0 %158 }
 0x132   :  { %v162_v49 = vpop.xlane.xlu1 %161  ;;  %v165_v52 = vpop.xlane.xlu0 %164 }
 0x133   :  { %324 = vlog2.f32 %v162_v49 }
 0x134   :  { %326 = vlog2.f32 %v159_v50 }
 0x135   :  { %328 = vlog2.f32 %v165_v52 }
 0x136   :  { %v168_v51 = vpop.xlane.xlu1 %167  ;;  %v171_v54 = vpop.xlane.xlu0 %170 }
 0x137   :  { %330 = vlog2.f32 %v168_v51 }
 0x138   :  { %332 = vlog2.f32 %v171_v54 }
 0x13a   :  { %v89_v53 = vpop.permute.xlu1 %88 }
 0x13b   :  { %vm103_vm2 = vcmp.eq.s32.totalorder %v83_v59, %v89_v53 }
 0x13c   :  { %v152_v10 = vsel %vm103_vm2, %v301_v63, 0.0 }
 0x13d   :  { %v325_v58 = vpop.eup %324  ;;  %v227_v18 = vsel %vm108_vm0, %v152_v10, 0.0 }
 0x13e   :  { %v92_v56 = vpop.permute.xlu1 %91  ;;  %v86_v57 = vpop.permute.xlu0 %85  ;;  %v178_v61 = vmul.f32 0.6931472, %v325_v58 }
 0x13f   :  { %v327_v60 = vpop.eup %326  ;;  %vm102_vm1 = vcmp.eq.s32.totalorder %v83_v59, %v86_v57  ;;  %vm104_vm3 = vcmp.eq.s32.totalorder %v83_v59, %v92_v56 }
 0x140   :  { %v176_v3 = vmul.f32 0.6931472, %v327_v60  ;;  %v151_v4 = vsel %vm102_vm1, %v301_v63, 0.0  ;;  %v329_v6 = vpop.eup %328  ;;  %v188_v7 = vadd.f32 %v178_v61, %v463_v19  ;;  %v153_v24 = vsel %vm104_vm3, %v301_v63, 0.0 }
 0x141   :  { %v331_v11 = vpop.eup %330  ;;  %v226_v12 = vsel %vm108_vm0, %v151_v4, 0.0  ;;  %v180_v16 = vmul.f32 0.6931472, %v329_v6  ;;  %v385_v60 = vmov 0.0  }
 0x142   :  { %v95_v62 = vpop.permute.xlu1 %94  ;;  %v187_v15 = vadd.f32 %v176_v3, %v455_v13  ;;  %v333_v21 = vpop.eup %332  ;;  %v182_v22 = vmul.f32 0.6931472, %v331_v11  ;;  %v194_v23 = vsub.f32 %v188_v7, %v426_v2  ;;  %v228_v26 = vadd.f32 %v227_v18, %v226_v12  ;;  %67 = vst.msk [vmem:[#allocation2] sm:$0x1] %vm66_vm7, %v385_v60  ;;  %68 = vst.msk [vmem:[#allocation3] sm:$0x1] %vm66_vm7, %v385_v60 }
 0x143   :  { %vm105_vm4 = vcmp.eq.s32.totalorder %v83_v59, %v95_v62  ;;  %v189_v19 = vadd.f32 %v180_v16, %v457_v14  ;;  %v184_v29 = vmul.f32 0.6931472, %v333_v21  ;;  %v229_v13 = vsel %vm108_vm0, %v153_v24, 0.0 }
 0x144   :  { %v193_v27 = vsub.f32 %v187_v15, %v416_v0  ;;  %v154_v28 = vsel %vm105_vm4, %v301_v63, 0.0  ;;  %v190_v30 = vadd.f32 %v182_v22, %v465_v20  ;;  %v200_v31 = vmul.f32 %v194_v23, %v152_v10 }
 0x145   :  { %v230_v32 = vadd.f32 %v229_v13, %v228_v26  ;;  %v231_v35 = vsel %vm108_vm0, %v154_v28, 0.0  ;;  %v195_v2 = vsub.f32 %v189_v19, %v421_v1  ;;  %v191_v0 = vadd.f32 %v184_v29, %v471_v25 }
 0x146   :  { %v98_v17 = vpop.permute.xlu1 %97  ;;  %v199_v36 = vmul.f32 %v193_v27, %v151_v4  ;;  %v206_v37 = vsel %vm108_vm0, %v200_v31, 0.0  ;;  %v196_v38 = vsub.f32 %v190_v30, %v435_v5 }
 0x147   :  { %vm106_vm5 = vcmp.eq.s32.totalorder %v83_v59, %v98_v17  ;;  %v232_v39 = vadd.f32 %v231_v35, %v230_v32  ;;  %v201_v40 = vmul.f32 %v195_v2, %v153_v24  ;;  %v197_v47 = vsub.f32 %v191_v0, %v444_v8 }
 0x148   :  { %v155_v33 = vsel %vm106_vm5, %v301_v63, 0.0  ;;  %v205_v41 = vsel %vm108_vm0, %v199_v36, 0.0  ;;  %v202_v46 = vmul.f32 %v196_v38, %v154_v28 }
 0x149   :  { %v233_v14 = vsel %vm108_vm0, %v155_v33, 0.0  ;;  %v207_v45 = vadd.f32 %v206_v37, %v205_v41  ;;  %v208_v25 = vsel %vm108_vm0, %v201_v40, 0.0  ;;  %v203_v51 = vmul.f32 %v197_v47, %v155_v33  ;;  %v247_v17 = vld [vmem:[#allocation2] sm:$0x1]  ;;  %v251_v18 = vld [vmem:[#allocation3] sm:$0x1] }
 0x14a   :  { %v234_v44 = vadd.f32 %v233_v14, %v232_v39  ;;  %v210_v50 = vsel %vm108_vm0, %v202_v46, 0.0 }
 0x14b   :  { %v209_v5 = vadd.f32 %v208_v25, %v207_v45  ;;  %v212_v56 = vsel %vm108_vm0, %v203_v51, 0.0 }
 0x14d   :  { %v211_v54 = vadd.f32 %v210_v50, %v209_v5 }
 0x14f   :  { %v213_v58 = vadd.f32 %v212_v56, %v211_v54 }
 0x177   :  { %v174_v34 = vpop.xlane.xlu1 %173 }
 0x178   :  { %334 = vlog2.f32 %v174_v34 }
 0x17b   :  { %v101_v20 = vpop.permute.xlu1 %100 }
 0x17c   :  { %vm107_vm6 = vcmp.eq.s32.totalorder %v83_v59, %v101_v20 }
 0x17d   :  { %v156_v42 = vsel %vm107_vm6, %v301_v63, 0.0 }
 0x17e   :  { %v235_v1 = vsel %vm108_vm0, %v156_v42, 0.0 }
 0x17f   :  { %v236_v48 = vadd.f32 %v235_v1, %v234_v44 }
 0x181   :  { %237 = vadd.xlane.f32.xlu0 %v236_v48 }
 0x182   :  { %v335_v49 = vpop.eup %334 }
 0x183   :  { %v186_v52 = vmul.f32 0.6931472, %v335_v49 }
 0x185   :  { %v192_v53 = vadd.f32 %v186_v52, %v495_v43 }
 0x187   :  { %v198_v55 = vsub.f32 %v192_v53, %v449_v9 }
 0x189   :  { %v204_v57 = vmul.f32 %v198_v55, %v156_v42 }
 0x18b   :  { %v214_v8 = vsel %vm108_vm0, %v204_v57, 0.0 }
 0x18c   :  { %v215_v59 = vadd.f32 %v214_v8, %v213_v58 }
 0x18e   :  { %216 = vadd.xlane.f32.xlu1 %v215_v59 }
 0x20e   :  { %v238_v61 = vpop.xlane.xlu0 %237 }
 0x20f   :  { %v239_v62 = vrot.slane %v238_v61, 4 }
 0x211   :  { %v240_v43 = vadd.f32 %v239_v62, %v238_v61 }
 0x213   :  { %v241_v63 = vrot.slane %v240_v43, 2 }
 0x215   :  { %v242_v6 = vadd.f32 %v241_v63, %v240_v43 }
 0x217   :  { %v243_v11 = vrot.slane %v242_v6, 1 }
 0x219   :  { %v244_v16 = vadd.f32 %v243_v11, %v242_v6 }
 0x21b   :  { %v217_v3 = vpop.xlane.xlu1 %216 }
 0x21c   :  { %v218_v9 = vrot.slane %v217_v3, 4 }
 0x21e   :  { %v219_v4 = vadd.f32 %v218_v9, %v217_v3 }
 0x220   :  { %v220_v7 = vrot.slane %v219_v4, 2 }
 0x222   :  { %v221_v10 = vadd.f32 %v220_v7, %v219_v4 }
 0x224   :  { %v222_v12 = vrot.slane %v221_v10, 1 }
 0x226   :  { %v223_v15 = vadd.f32 %v222_v12, %v221_v10 }
 0x228   :  { %302 = vpush %v223_v15 }
 0x229   :  { %304 = vpush %v244_v16 }
 0x259   :  { %s303_s2 = spop %302 }
 0x25a   :  { %v225_v21 = vstv %s303_s2  ;;  %s305_s13 = spop %304 }
 0x25b   :  { %v248_v22 = vadd.f32 %v247_v17, %v225_v21  ;;  %v246_v23 = vstv %s305_s13 }
 0x25c   :  { %v252_v24 = vadd.f32 %v251_v18, %v246_v23 }
 0x25d   :  { %250 = vst.msk [vmem:[#allocation2] sm:$0x1] %vm66_vm7, %v248_v22 }
 0x25e   :  { %253 = vst.msk [vmem:[#allocation3] sm:$0x1] %vm66_vm7, %v252_v24 }
 0x264   :  { %v257_v26 = vld [vmem:[#allocation2] sm:$0x1] }
 0x265   :  { %258 = vst.msk [vmem:[#allocation4] sm:$0x1] %vm66_vm7, %v257_v26  ;;  %v259_v19 = vld [vmem:[#allocation3] sm:$0x1] }
 0x266   :  { %347 = shalt.err (!%p344_p4)
}
 0x267   :  { %s348_s22 = scalar_lea.hbm %s571_s3, 16 }
 0x268   :  { %p349_p5 = scmp.ne.s32.totalorder %s571_s3, %s348_s22  ;;  %p352_p6 = scmp.lt.u32.totalorder %s348_s22, %s571_s3 }
 0x26a   :  { %p354_p7 = pnand %p352_p6, %p349_p5 }
 0x26c   :  { %357 = shalt.err (!%p354_p7)
}
 0x26d   :  { %270 = dma.vmem_to_hbm [thread:$0]  %s268_s15, 16, %s571_s3, [#allocation5]   ;;  %260 = vst.msk [vmem:[#allocation6] sm:$0x1] %vm66_vm7, %v259_v19 }
 0x26e   :  { %s358_s28 = scalar_lea.vmem %s534_s17, 16  ;;  %s362_s29 = scalar_lea.vmem %s534_s17, 32 }
 0x26f   :  { %p359_p8 = scmp.ne.s32.totalorder %s534_s17, %s358_s28  ;;  %p363_p9 = scmp.lt.s32.totalorder %s534_s17, %s534_s17 }
 0x270   :  { %p364_p10 = scmp.lt.s32.totalorder %s362_s29, %s358_s28 }
 0x272   :  { %p365_p11 = por %p364_p10, %p363_p9 }
 0x274   :  { %p366_p12 = pnand %p365_p11, %p359_p8 }
 0x276   :  { %369 = shalt.err (!%p366_p12)
}
 0x277   :  { %s370_s6 = scalar_lea.hbm %s572_s4, 16 }
 0x278   :  { %p371_p13 = scmp.ne.s32.totalorder %s572_s4, %s370_s6  ;;  %p374_p0 = scmp.lt.u32.totalorder %s370_s6, %s572_s4 }
 0x27a   :  { %p376_p1 = pnand %p374_p0, %p371_p13 }
 0x27c   :  { %379 = shalt.err (!%p376_p1)
}
 0x27d   :  { %280 = dma.vmem_to_hbm [thread:$0]  %s534_s17, 16, %s572_s4, [#allocation7]  }
 0x27e   :  { %380 = dma.done.wait [#allocation5], 16  }
 0x27f   :  { %381 = vsyncadd [#allocation5], 4294967280 }
 0x280   :  { %382 = dma.done.wait [#allocation7], 16  }
 0x281   :  { %383 = vsyncadd [#allocation7], 4294967280 }
 0x282   :  { %287 = vsyncpa [#allocation5], 1 }
 0x283   :  { %288 = vsyncpa [#allocation7], 1 }

</bundles_post_ra>
